<compile_context>
chip_gen: v7x
topology: tpu7x:2x2x1
jax: 0.10.0
libtpu: 0.0.40
codegen_flags: <defaults>
</compile_context>

<pallas_src>
import functools

import jax
import jax.numpy as jnp
import numpy as np
from jax.experimental import pallas as pl
from jax.experimental.pallas import tpu as pltpu


def _cdiv(a, b):
    return -(-a // b)


def _round_up(a, b):
    return _cdiv(a, b) * b


def _vmem_capacity_bytes():
    """Physical VMEM per TensorCore, with a conservative (v7x-safe) fallback."""
    try:
        return int(pltpu.get_tpu_info().vmem_capacity_bytes)
    except Exception:
        return 64 * 2**20


def _pick_tile_n(N, Cin, Cout_pad, itemsize, vmem_cap_bytes):
    """Token-tile rows: MXU/layout aligned, generation-aware VMEM budget, balanced."""
    sublane = {1: 32, 2: 16}.get(itemsize, 8)       # int8 / bf16 / f32 sublane packing
    align = max(128, sublane)                       # keeps MXU passes & vreg tiles full
    small_vmem = vmem_cap_bytes <= 64 * 2**20       # v7x: 64 MiB per TensorCore
    budget = (4 if small_vmem else 8) * 2**20       # 512-row tiles ~85% of HBM roofline
    row_cap = 512 if small_vmem else 1024
    per_row = 2 * (Cin + Cout_pad) * itemsize       # double-buffered input + output row
    cap = min(budget // max(per_row, 1), row_cap)
    cap = max((cap // align) * align, align)
    if cap >= 512:                                  # prefer full 256-deep MXU passes
        cap = (cap // 256) * 256
    n_al = _round_up(N, align)
    if n_al <= cap:
        return n_al                                 # single tile per batch row
    # Balance tiles so the last one is not mostly padding.
    n_tiles = _cdiv(n_al, cap)
    tn = _round_up(_cdiv(n_al, n_tiles), align)
    return max(align, min(tn, cap))


def _reslinear_kernel(inp_ref, bias_ref, wl_ref, out_ref, *, wl_gain):
    """inp_ref: [TN, Cin], bias_ref: [1, Cout_pad] (f32, style branch folded in),
    wl_ref: [Cin, Cout_pad], out_ref: [TN, Cout_pad]."""
    acc = jnp.dot(inp_ref[...], wl_ref[...],
                  preferred_element_type=jnp.float32)       # [TN, Cout_pad] f32
    out_ref[...] = (acc * wl_gain + bias_ref[...]).astype(out_ref.dtype)


def res_linear(inp, style, w_style, w_linear, *, tile_n=None, compute_dtype=None):
    """inp: [B, N, Cin], style: [B, S], w_style: [Cin, S], w_linear: [Cout, Cin]
    (PyTorch [out_features, in_features] weight convention)."""
    B, N, Cin = inp.shape
    S = style.shape[1]
    Cout = w_linear.shape[0]

    ws_gain = float(1.0 / np.sqrt(S))      # FullyConnectedLayer(style_size, in_channels)
    wl_gain = float(1.0 / np.sqrt(Cin))    # FullyConnectedLayer(in_channels, out_channels)

    out_dtype = inp.dtype
    cdt = jnp.dtype(compute_dtype) if compute_dtype is not None else jnp.dtype(inp.dtype)

    # Pre-transposed weights -> lane-dense contraction, no in-kernel transposes.
    ws_t = jnp.transpose(w_style).astype(jnp.float32)       # [S, Cin]
    wl_t = jnp.transpose(w_linear)                           # [Cin, Cout]

    # Lane-dense output stores: pad Cout to a multiple of 128, slice afterwards.
    cout_p = _round_up(Cout, 128)
    if cout_p != Cout:
        wl_t = jnp.pad(wl_t, ((0, 0), (0, cout_p - Cout)))

    # Fold the style branch into a per-batch output bias (plain XLA, f32):
    # (x + s) @ W == x @ W + s @ W.  No carried scratch -> both grid axes "parallel".
    s = jnp.dot(style.astype(jnp.float32), ws_t) * ws_gain           # [B, Cin]
    bias = jnp.dot(s, wl_t.astype(jnp.float32)) * wl_gain            # [B, Cout_pad]
    bias = bias.reshape(B, 1, cout_p)

    x = inp.astype(cdt)
    wl_c = wl_t.astype(cdt)

    itemsize = jnp.dtype(cdt).itemsize
    out_itemsize = jnp.dtype(out_dtype).itemsize
    vmem_cap = _vmem_capacity_bytes()
    if tile_n is None:
        tile_n = _pick_tile_n(N, Cin, cout_p, itemsize, vmem_cap)

    n_tiles = _cdiv(N, tile_n)
    n_pad = n_tiles * tile_n
    if n_pad != N:
        x = jnp.pad(x, ((0, 0), (0, n_pad - N), (0, 0)))

    # VMEM plan: double-buffered in/out tiles + single-buffered resident weight
    # + tiny f32 bias rows.  Clamp the scoped limit to the chip's physical VMEM.
    est_vmem = (2 * tile_n * Cin * itemsize
                + 2 * tile_n * cout_p * out_itemsize
                + Cin * cout_p * itemsize
                + 2 * cout_p * 4)
    vmem_ceiling = (vmem_cap * 3) // 4
    vmem_limit = int(min(vmem_ceiling, max(32 * 2**20, 2 * est_vmem)))
    # TODO(synk): if est_vmem ever exceeds vmem_ceiling (huge Cin*Cout on v7x), add a
    # K-tiled third "arbitrary" grid axis with an f32 accumulator instead of keeping
    # the full weight resident.
    # TODO(synk): sweep pipeline_mode=pl.Buffered(3) on the token-tile spec if profiling
    # shows exposed DMA (HBM-bound small Cin*Cout).

    kernel = functools.partial(_reslinear_kernel, wl_gain=wl_gain)

    def _run(single_buffer_weight):
        wl_kwargs = {"pipeline_mode": pl.Buffered(1)} if single_buffer_weight else {}
        return pl.pallas_call(
            kernel,
            out_shape=jax.ShapeDtypeStruct((B, n_pad, cout_p), out_dtype),
            grid=(B, n_tiles),
            in_specs=[
                pl.BlockSpec((None, tile_n, Cin), lambda b, t: (b, t, 0)),   # token tile
                pl.BlockSpec((None, 1, cout_p), lambda b, t: (b, 0, 0)),     # folded bias
                pl.BlockSpec((Cin, cout_p), lambda b, t: (0, 0),             # W_linear^T
                             **wl_kwargs),                                   # (resident)
            ],
            out_specs=pl.BlockSpec((None, tile_n, cout_p), lambda b, t: (b, t, 0)),
            compiler_params=pltpu.CompilerParams(
                dimension_semantics=("parallel", "parallel"),
                vmem_limit_bytes=vmem_limit),
        )(x, bias, wl_c)

    try:
        out = _run(True)     # grid-invariant weight: single VMEM copy
    except Exception:        # fallback if single-buffering is unsupported
        out = _run(False)

    return out[:, :N, :Cout]


def res_linear_ref(inp, style, w_style, w_linear):
    """Plain-JAX reference mirroring the PyTorch forward."""
    S = style.shape[1]
    Cin = inp.shape[-1]
    s = style @ (w_style * (1.0 / np.sqrt(S))).T          # [B, Cin]
    x = inp + s[:, None, :]                               # [B, N, Cin]
    return x @ (w_linear * (1.0 / np.sqrt(Cin))).T        # [B, N, Cout]


if __name__ == "__main__":
    # Small shapes consistent with the module's forward contract.
    B, N = 2, 8
    in_channels, out_channels, style_size = 32, 64, 16

    key = jax.random.PRNGKey(0)
    k_inp, k_sty, k_ws, k_wl = jax.random.split(key, 4)

    inp = jax.random.normal(k_inp, (B, N, in_channels), dtype=jnp.float32)
    style = jax.random.normal(k_sty, (B, style_size), dtype=jnp.float32)
    # PyTorch parameter shape convention: [out_features, in_features].
    w_style = jax.random.normal(k_ws, (in_channels, style_size), dtype=jnp.float32)
    w_linear = jax.random.normal(k_wl, (out_channels, in_channels), dtype=jnp.float32)

    ref = res_linear_ref(inp, style, w_style, w_linear)

    # f32 path (exact semantics, strict tolerance).
    out = jax.block_until_ready(res_linear(inp, style, w_style, w_linear))
    np.testing.assert_allclose(np.asarray(out), np.asarray(ref), rtol=1e-5, atol=1e-5)

    # bf16 fast path (MXU peak, half HBM traffic); f32 accumulation, looser tolerance.
    out_bf16 = jax.block_until_ready(
        res_linear(inp, style, w_style, w_linear, compute_dtype=jnp.bfloat16))
    np.testing.assert_allclose(np.asarray(out_bf16), np.asarray(ref), rtol=5e-2, atol=5e-2)

    print("KERNEL_OK")
</pallas_src>

<mosaic_0001>
module attributes {stable_mosaic.version = 11 : i64} {
  func.func @_reslinear_kernel(%arg0: i32, %arg1: i32, %arg2: memref<1x128x32xf32, #tpu.memory_space<vmem>>, %arg3: memref<1x1x128xf32, #tpu.memory_space<vmem>>, %arg4: memref<32x128xf32, #tpu.memory_space<vmem>>, %arg5: memref<1x128x128xf32, #tpu.memory_space<vmem>>) attributes {dimension_semantics = [#tpu.dimension_semantics<parallel>, #tpu.dimension_semantics<parallel>], iteration_bounds = array<i64: 2, 1>, scalar_prefetch = 0 : i64, scratch_operands = 0 : i64, tpu.core_type = #tpu.core_type<tc>, window_params = [{transform_indices = @transform_0, window_bounds = array<i64: 1, 128, 32>}, {transform_indices = @transform_1, window_bounds = array<i64: 1, 1, 128>}, {pipeline_mode = #tpu.pipeline_mode<synchronous>, transform_indices = @transform_2, window_bounds = array<i64: 32, 128>}, {transform_indices = @transform_3, window_bounds = array<i64: 1, 128, 128>}]} {
    %c0 = arith.constant 0 : index
    %c0_0 = arith.constant 0 : index
    %c0_1 = arith.constant 0 : index
    %0 = vector.load %arg2[%c0, %c0_0, %c0_1] : memref<1x128x32xf32, #tpu.memory_space<vmem>>, vector<1x128x32xf32>
    %1 = vector.shape_cast %0 : vector<1x128x32xf32> to vector<128x32xf32>
    %c0_2 = arith.constant 0 : index
    %c0_3 = arith.constant 0 : index
    %2 = vector.load %arg4[%c0_2, %c0_3] : memref<32x128xf32, #tpu.memory_space<vmem>>, vector<32x128xf32>
    %cst = arith.constant dense<0.000000e+00> : vector<128x128xf32>
    %3 = tpu.matmul %1, %2, %cst {dimension_numbers = #tpu.dot_dimension_numbers<[1], [0], [0], [1], [0, 0, 1, 1], [], []>} : vector<128x32xf32>, vector<32x128xf32>, vector<128x128xf32> -> vector<128x128xf32>
    %cst_4 = arith.constant 0.176776692 : f32
    %4 = vector.broadcast %cst_4 : f32 to vector<128x128xf32>
    %5 = arith.mulf %3, %4 : vector<128x128xf32>
    %c0_5 = arith.constant 0 : index
    %c0_6 = arith.constant 0 : index
    %c0_7 = arith.constant 0 : index
    %6 = vector.load %arg3[%c0_5, %c0_6, %c0_7] : memref<1x1x128xf32, #tpu.memory_space<vmem>>, vector<1x1x128xf32>
    %7 = vector.shape_cast %6 : vector<1x1x128xf32> to vector<1x128xf32>
    %8 = vector.broadcast %7 : vector<1x128xf32> to vector<128x128xf32>
    %9 = arith.addf %5, %8 : vector<128x128xf32>
    %c0_8 = arith.constant 0 : index
    %c0_9 = arith.constant 0 : index
    %c0_10 = arith.constant 0 : index
    %10 = vector.load %arg5[%c0_8, %c0_9, %c0_10] : memref<1x128x128xf32, #tpu.memory_space<vmem>>, vector<1x128x128xf32>
    %11 = vector.shape_cast %10 : vector<1x128x128xf32> to vector<128x128xf32>
    %12 = vector.shape_cast %9 : vector<128x128xf32> to vector<1x128x128xf32>
    tpu.vector_store %arg5[%c0_8, %c0_9, %c0_10], %12 {strides = array<i32>} : memref<1x128x128xf32, #tpu.memory_space<vmem>>, vector<1x128x128xf32>,
    return
  }
  func.func @transform_0(%arg0: i32, %arg1: i32) -> (i32, i32, i32) {
    %c0_i32 = arith.constant 0 : i32
    %c0_i32_0 = arith.constant 0 : i32
    return %arg0, %arg1, %c0_i32 : i32, i32, i32
  }
  func.func @transform_1(%arg0: i32, %arg1: i32) -> (i32, i32, i32) {
    %c0_i32 = arith.constant 0 : i32
    %c0_i32_0 = arith.constant 0 : i32
    %c0_i32_1 = arith.constant 0 : i32
    return %arg0, %c0_i32, %c0_i32_0 : i32, i32, i32
  }
  func.func @transform_2(%arg0: i32, %arg1: i32) -> (i32, i32) {
    %c0_i32 = arith.constant 0 : i32
    %c0_i32_0 = arith.constant 0 : i32
    %c0_i32_1 = arith.constant 0 : i32
    return %c0_i32, %c0_i32_0 : i32, i32
  }
  func.func @transform_3(%arg0: i32, %arg1: i32) -> (i32, i32, i32) {
    %c0_i32 = arith.constant 0 : i32
    %c0_i32_0 = arith.constant 0 : i32
    return %arg0, %arg1, %c0_i32 : i32, i32, i32
  }
}

module attributes {stable_mosaic.version = 11 : i64} {
  func.func @_reslinear_kernel(%arg0: i32, %arg1: i32, %arg2: memref<1x128x32xf32, #tpu.memory_space<vmem>>, %arg3: memref<1x1x128xf32, #tpu.memory_space<vmem>>, %arg4: memref<32x128xf32, #tpu.memory_space<vmem>>, %arg5: memref<1x128x128xf32, #tpu.memory_space<vmem>>) attributes {dimension_semantics = [#tpu.dimension_semantics<parallel>, #tpu.dimension_semantics<parallel>], iteration_bounds = array<i64: 2, 1>, scalar_prefetch = 0 : i64, scratch_operands = 0 : i64, tpu.core_type = #tpu.core_type<tc>, window_params = [{transform_indices = @transform_0, window_bounds = array<i64: 1, 128, 32>}, {transform_indices = @transform_1, window_bounds = array<i64: 1, 1, 128>}, {pipeline_mode = #tpu.pipeline_mode<synchronous>, transform_indices = @transform_2, window_bounds = array<i64: 32, 128>}, {transform_indices = @transform_3, window_bounds = array<i64: 1, 128, 128>}]} {
    %c0 = arith.constant 0 : index
    %c0_0 = arith.constant 0 : index
    %c0_1 = arith.constant 0 : index
    %0 = vector.load %arg2[%c0, %c0_0, %c0_1] : memref<1x128x32xf32, #tpu.memory_space<vmem>>, vector<1x128x32xf32>
    %1 = vector.shape_cast %0 : vector<1x128x32xf32> to vector<128x32xf32>
    %c0_2 = arith.constant 0 : index
    %c0_3 = arith.constant 0 : index
    %2 = vector.load %arg4[%c0_2, %c0_3] : memref<32x128xf32, #tpu.memory_space<vmem>>, vector<32x128xf32>
    %cst = arith.constant dense<0.000000e+00> : vector<128x128xf32>
    %3 = tpu.matmul %1, %2, %cst {dimension_numbers = #tpu.dot_dimension_numbers<[1], [0], [0], [1], [0, 0, 1, 1], [], []>} : vector<128x32xf32>, vector<32x128xf32>, vector<128x128xf32> -> vector<128x128xf32>
    %cst_4 = arith.constant 0.176776692 : f32
    %4 = vector.broadcast %cst_4 : f32 to vector<128x128xf32>
    %5 = arith.mulf %3, %4 : vector<128x128xf32>
    %c0_5 = arith.constant 0 : index
    %c0_6 = arith.constant 0 : index
    %c0_7 = arith.constant 0 : index
    %6 = vector.load %arg3[%c0_5, %c0_6, %c0_7] : memref<1x1x128xf32, #tpu.memory_space<vmem>>, vector<1x1x128xf32>
    %7 = vector.shape_cast %6 : vector<1x1x128xf32> to vector<1x128xf32>
    %8 = vector.broadcast %7 : vector<1x128xf32> to vector<128x128xf32>
    %9 = arith.addf %5, %8 : vector<128x128xf32>
    %c0_8 = arith.constant 0 : index
    %c0_9 = arith.constant 0 : index
    %c0_10 = arith.constant 0 : index
    %10 = vector.load %arg5[%c0_8, %c0_9, %c0_10] : memref<1x128x128xf32, #tpu.memory_space<vmem>>, vector<1x128x128xf32>
    %11 = vector.shape_cast %10 : vector<1x128x128xf32> to vector<128x128xf32>
    %12 = vector.shape_cast %9 : vector<128x128xf32> to vector<1x128x128xf32>
    tpu.vector_store %arg5[%c0_8, %c0_9, %c0_10], %12 {strides = array<i32>} : memref<1x128x128xf32, #tpu.memory_space<vmem>>, vector<1x128x128xf32>,
    return
  }
  func.func @transform_0(%arg0: i32, %arg1: i32) -> (i32, i32, i32) {
    %c0_i32 = arith.constant 0 : i32
    %c0_i32_0 = arith.constant 0 : i32
    return %arg0, %arg1, %c0_i32 : i32, i32, i32
  }
  func.func @transform_1(%arg0: i32, %arg1: i32) -> (i32, i32, i32) {
    %c0_i32 = arith.constant 0 : i32
    %c0_i32_0 = arith.constant 0 : i32
    %c0_i32_1 = arith.constant 0 : i32
    return %arg0, %c0_i32, %c0_i32_0 : i32, i32, i32
  }
  func.func @transform_2(%arg0: i32, %arg1: i32) -> (i32, i32) {
    %c0_i32 = arith.constant 0 : i32
    %c0_i32_0 = arith.constant 0 : i32
    %c0_i32_1 = arith.constant 0 : i32
    return %c0_i32, %c0_i32_0 : i32, i32
  }
  func.func @transform_3(%arg0: i32, %arg1: i32) -> (i32, i32, i32) {
    %c0_i32 = arith.constant 0 : i32
    %c0_i32_0 = arith.constant 0 : i32
    return %arg0, %arg1, %c0_i32 : i32, i32, i32
  }
}

</mosaic_0001>

<bundles_post_ra>
// kernel: tpu_custom_call.1
= control target key start
LH: loop header
LB: loop body
LE: loop exit
PB: predicated region body
PF: predicated region fallthrough
CT: control target
= control target key end

     0   :  { %8 = vsyncpa [#allocation3], 0  ;;  %s1052_s0 = inlined_call_operand.vmem [shape: f32[2,128,32], index: 0, kind: input, shape index: {}]   ;;  %s1053_s1 = inlined_call_operand.vmem [shape: f32[2,1,128], index: 1, kind: input, shape index: {}]   ;;  %s1054_s2 = inlined_call_operand.vmem [shape: f32[32,128], index: 2, kind: input, shape index: {}]   ;;  %s1055_s3 = inlined_call_operand.hbm [shape: f32[2,128,128], index: 3, kind: output, shape index: {}]  }
   0x1   :  { %10 = vsyncpa [#allocation3 + $0x1], 0  ;;  %s843_s12 = smov 0   ;;  %s845_s13 = smov 0  }
   0x2   :  { %s847_s14 = smov 0   ;;  %s849_s15 = smov 0  }
   0x3   :  { %s851_s16 = smov 0   ;;  %s853_s17 = smov 0  }
   0x4 LB: > { %s587_s18 = sadd.s32 4294967295, %s818_s17   ;;  %s588_s19 = sadd.s32 4294967294, %s818_s17   ;;  %s818_s17 = sphi %s853_s17, %s16_s17   ;;  %s814_s16 = sphi %s851_s16, %s1062_s16   ;;  %s810_s15 = sphi %s849_s15, %s1061_s15   ;;  %s806_s14 = sphi %s847_s14, %s1060_s14   ;;  %s802_s13 = sphi %s845_s13, %s1059_s13   ;;  %s798_s12 = sphi %s843_s12, %s1058_s12  }
   0x5   : > { %s28_s20 = sadd.s32 1, %s814_s16  ;;  %s112_s21 = sadd.s32 1, %s806_s14 }
   0x6   : > { %p30_p0 = scmp.ge.s32.totalorder %s28_s20, 2  ;;  %p122_p1 = scmp.ne.s32.totalorder %s806_s14, %s802_s13 }
   0x7   : > { %p123_p2 = scmp.eq.s32.totalorder %s587_s18, 1  ;;  %p128_p3 = scmp.ne.s32.totalorder %s802_s13, %s798_s12 }
   0x8   : > { %s1064_s20 = smov (%p30_p0, %s28_s20), 0  ;;  %p129_p5 = scmp.eq.s32.totalorder %s588_s19, 1 }
   0x9   : > { %p883_p4 = por %p123_p2, %p122_p1  ;;  %s107_s23 = ssub.s32 %s814_s16, %s1064_s20 }
   0xa   : > { %p591_p6 = scmp.ge.s32.totalorder %s818_s17, 1  ;;  %p110_p7 = scmp.eq.s32.totalorder %s107_s23, 0 }
   0xb   : > { %p890_p8 = por %p129_p5, %p128_p3  ;;  %p169_p9 = scmp.lt.s32.totalorder %s818_s17, 3 }
   0xc   : > { %s896_s25 = scalar_select %p110_p7, %s806_s14, %s112_s21  }
   0xd   : > { %p170_p10 = pnand %p591_p6, %p169_p9 }
   0xe   : > { %v230_v0 = vld [vmem:[%s1054_s2] sm:$0xff] (!%p170_p10)  ;;  %v231_v1 = vld [vmem:[%s1054_s2 + $0x8] sm:$0xff] (!%p170_p10)  ;;  %v232_v2 = vld [vmem:[%s1054_s2 + $0x10] sm:$0xff] (!%p170_p10)  ;;  %p201_p11 = scmp.lt.s32.totalorder (!%p170_p10), %s810_s15, 1  ;;  %vm234_vm0 = vcmask (!%p170_p10), 261120   ;;  %s197_s18 = sand.u32 (!%p170_p10), 1, %s802_s13  }
   0xf   : > { %173 = sbr.rel (%p170_p10) target bundleno = 273 (0x111), region = 32  ;;  %v671_v3 = vpack.c.bf16 (!%p170_p10), %v231_v1, %v230_v0  ;;  %v233_v4 = vld [vmem:[%s1054_s2 + $0x18] sm:$0xff] (!%p170_p10)  ;;  %s592_s26 = sshll.u32 (!%p170_p10), %s197_s18, 7 }
  0x10   : > { %v675_v5 = vpack.c.bf16 (!%p170_p10), %v233_v4, %v232_v2  ;;  %s965_s27 = scalar_lea.vmem (!%p170_p10), [#allocation2], %s592_s26  ;;  %s618_s28 = sshll.u32 (!%p170_p10), %s810_s15, 11 }
  0x11   : > { %672 = vmatprep.subr.bf16.mxu0 (!%p170_p10), %v671_v3  ;;  %679 = vmatprep.subr.bf16.mxu1 (!%p170_p10), %v671_v3  ;;  %s499_s29 = sshll.u32 (!%p170_p10), %s965_s27, 4  ;;  %s994_s4 = scalar_lea.hbm (!%p170_p10), %s1055_s3, %s618_s28  ;;  %s996_s29 = int_to_ptr.vmem [resolvable:$true] %s499_s29 }
  0x12   : > { %674 = vmatpush3.bf16.msra.mxu0 (!%p170_p10), %v671_v3  ;;  %681 = vmatpush3.bf16.msra.mxu1 (!%p170_p10), %v671_v3  ;;  %s1006_s5 = scalar_lea.sflag (!%p170_p10), [#allocation3], %s197_s18  ;;  %s740_s6 = scalar_lea.vmem (!%p170_p10), %s996_s29, 2048 }
  0x13   : > { %676 = vmatprep.subr.bf16.mxu0 (!%p170_p10), %v675_v5  ;;  %680 = vmatprep.subr.bf16.mxu1 (!%p170_p10), %v675_v5  ;;  %p741_p12 = scmp.ne.s32.totalorder (!%p170_p10), %s996_s29, %s740_s6 }
  0x15   : > { %p742_p13 = pnand (!%p170_p10), %p741_p12, %p883_p4 }
  0x16   : > { %s912_s7 = scalar_select %p201_p11, %s810_s15, 1  ;;  %678 = vmatpush3.bf16.msra.mxu0 %v675_v5  ;;  %682 = vmatpush3.bf16.msra.mxu1 %v675_v5 }
  0x17   : > { %p743_p0 = pneg %p742_p13 }
  0x18   : > { %s617_s8 = sshll.u32 %s912_s7, 7  ;;  %s212_s23 = scalar_lea.vmem %s1053_s1, %s912_s7 }
  0x19   : > { %s918_s11 = scalar_lea.vmem %s1052_s0, %s617_s8  ;;  %v959_v23 = vld [vmem:[%s212_s23] ss:$0 sm:$0xff]  ;;  %s820_s7 = smov [#allocation2]  }
  0x1a   : > { %v214_v6 = vld [vmem:[%s918_s11] sm:$0xff]  ;;  %v215_v8 = vld [vmem:[%s918_s11 + $0x8] sm:$0xff]  ;;  %v216_v10 = vld [vmem:[%s918_s11 + $0x10] sm:$0xff]  ;;  %s744_s8 = sshll.u32 %s820_s7, 4  ;;  %s745_s8 = int_to_ptr.vmem [resolvable:$false] %s744_s8 }
  0x1b   : > { %v222_v7 = vld [vmem:[%s918_s11 + $0x40] sm:$0xff]  ;;  %647 = vmatprep.mubr.msk.f32.mxu0 %vm234_vm0, %v214_v6  ;;  %v223_v9 = vld [vmem:[%s918_s11 + $0x48] sm:$0xff]  ;;  %v224_v11 = vld [vmem:[%s918_s11 + $0x50] sm:$0xff]  ;;  %s746_s9 = scalar_lea.vmem %s745_s8, 4096  ;;  %p747_p1 = scmp.lt.s32.totalorder %s996_s29, %s745_s8 }
  0x1c   : > { %659 = vmatprep.mubr.msk.f32.mxu1 %vm234_vm0, %v222_v7  ;;  %648 = vmatmul.mubr.msk.f32.vlgmr.msra.gmra.mrb[0].mxu0 %vm234_vm0, %v215_v8  ;;  %v217_v12 = vld [vmem:[%s918_s11 + $0x18] sm:$0xff]  ;;  %v218_v14 = vld [vmem:[%s918_s11 + $0x20] sm:$0xff]  ;;  %v219_v16 = vld [vmem:[%s918_s11 + $0x28] sm:$0xff]  ;;  %p748_p2 = scmp.lt.s32.totalorder %s746_s9, %s740_s6 }
  0x1d   : > { %660 = vmatmul.mubr.msk.f32.vlgmr.msra.gmra.mrb[0].mxu1 %vm234_vm0, %v223_v9  ;;  %650 = vmatprep.mubr.msk.f32.mxu0 %vm234_vm0, %v216_v10  ;;  %v225_v13 = vld [vmem:[%s918_s11 + $0x58] sm:$0xff]  ;;  %v226_v15 = vld [vmem:[%s918_s11 + $0x60] sm:$0xff]  ;;  %v227_v17 = vld [vmem:[%s918_s11 + $0x68] sm:$0xff] }
  0x1e   : > { %662 = vmatprep.mubr.msk.f32.mxu1 %vm234_vm0, %v224_v11  ;;  %v220_v18 = vld [vmem:[%s918_s11 + $0x30] sm:$0xff]  ;;  %v221_v20 = vld [vmem:[%s918_s11 + $0x38] sm:$0xff]  ;;  %p749_p3 = por %p748_p2, %p747_p1 }
  0x1f   : > { %v228_v19 = vld [vmem:[%s918_s11 + $0x70] sm:$0xff]  ;;  %v229_v21 = vld [vmem:[%s918_s11 + $0x78] sm:$0xff] }
  0x20   : > { %651 = vmatmul.mubr.msk.f32.gmra.mrb[2].mxu0 %vm234_vm0, %v217_v12  ;;  %p750_p5 = pnand %p749_p3, %p743_p0 }
  0x21   : > { %663 = vmatmul.mubr.msk.f32.gmra.mrb[2].mxu1 %vm234_vm0, %v225_v13  ;;  %653 = vmatprep.mubr.msk.f32.mxu0 %vm234_vm0, %v218_v14 }
  0x22   : > { %665 = vmatprep.mubr.msk.f32.mxu1 %vm234_vm0, %v226_v15 }
  0x24   : > { %654 = vmatmul.mubr.msk.f32.gmra.mrb[4].mxu0 %vm234_vm0, %v219_v16 }
  0x25   : > { %666 = vmatmul.mubr.msk.f32.gmra.mrb[4].mxu1 %vm234_vm0, %v227_v17  ;;  %656 = vmatprep.mubr.msk.f32.mxu0 %vm234_vm0, %v220_v18 }
  0x26   : > { %668 = vmatprep.mubr.msk.f32.mxu1 %vm234_vm0, %v228_v19 }
  0x28   : > { %657 = vmatmul.mubr.msk.f32.gmra.mrb[6].mxu0 %vm234_vm0, %v221_v20 }
  0x29   : > { %669 = vmatmul.mubr.msk.f32.gmra.mrb[6].mxu1 %vm234_vm0, %v229_v21 }
  0xef   : > { %v649_v22 = vpop.f32.mrb[0].mxu0 }
  0xf0   : > { %v661_v24 = vpop.f32.mrb[0].mxu1  ;;  %v429_v25 = vmul.f32 0.17677669, %v649_v22  ;;  %v349_v27 = vpop.f32.mrb[1].mxu0 }
  0xf1   : > { %v437_v26 = vmul.f32 0.17677669, %v661_v24  ;;  %v389_v28 = vpop.f32.mrb[1].mxu1  ;;  %v428_v29 = vmul.f32 0.17677669, %v349_v27 }
  0xf2   : > { %v436_v30 = vmul.f32 0.17677669, %v389_v28  ;;  %v452_v31 = vadd.f32 %v959_v23, %v429_v25 }
  0xf3   : > { %v460_v32 = vadd.f32 %v959_v23, %v437_v26  ;;  %v451_v33 = vadd.f32 %v959_v23, %v428_v29  ;;  %v652_v35 = vpop.f32.mrb[2].mxu0 }
  0xf4   : > { %v459_v34 = vadd.f32 %v959_v23, %v436_v30  ;;  %v664_v36 = vpop.f32.mrb[2].mxu1  ;;  %468 = vst [vmem:[%s965_s27 + $0x8] sm:$0xff] %v452_v31  ;;  %v431_v37 = vmul.f32 0.17677669, %v652_v35  ;;  %v359_v39 = vpop.f32.mrb[3].mxu0 }
  0xf5   : > { %476 = vst [vmem:[%s965_s27 + $0x48] sm:$0xff] %v460_v32  ;;  %v439_v38 = vmul.f32 0.17677669, %v664_v36  ;;  %v399_v40 = vpop.f32.mrb[3].mxu1  ;;  %467 = vst [vmem:[%s965_s27] sm:$0xff] %v451_v33  ;;  %v430_v41 = vmul.f32 0.17677669, %v359_v39 }
  0xf6   : > { %475 = vst [vmem:[%s965_s27 + $0x40] sm:$0xff] %v459_v34  ;;  %v438_v42 = vmul.f32 0.17677669, %v399_v40  ;;  %v454_v43 = vadd.f32 %v959_v23, %v431_v37 }
  0xf7   : > { %v462_v44 = vadd.f32 %v959_v23, %v439_v38  ;;  %v453_v45 = vadd.f32 %v959_v23, %v430_v41  ;;  %v655_v47 = vpop.f32.mrb[4].mxu0 }
  0xf8   : > { %v461_v46 = vadd.f32 %v959_v23, %v438_v42  ;;  %v667_v48 = vpop.f32.mrb[4].mxu1  ;;  %470 = vst [vmem:[%s965_s27 + $0x18] sm:$0xff] %v454_v43  ;;  %v433_v49 = vmul.f32 0.17677669, %v655_v47  ;;  %v369_v51 = vpop.f32.mrb[5].mxu0 }
  0xf9   : > { %478 = vst [vmem:[%s965_s27 + $0x58] sm:$0xff] %v462_v44  ;;  %v441_v50 = vmul.f32 0.17677669, %v667_v48  ;;  %v409_v52 = vpop.f32.mrb[5].mxu1  ;;  %469 = vst [vmem:[%s965_s27 + $0x10] sm:$0xff] %v453_v45 }
  0xfa   : > { %477 = vst [vmem:[%s965_s27 + $0x50] sm:$0xff] %v461_v46  ;;  %v432_v53 = vmul.f32 0.17677669, %v369_v51  ;;  %v440_v54 = vmul.f32 0.17677669, %v409_v52  ;;  %v456_v55 = vadd.f32 %v959_v23, %v433_v49 }
  0xfb   : > { %v464_v56 = vadd.f32 %v959_v23, %v441_v50  ;;  %v658_v59 = vpop.f32.mrb[6].mxu0 }
  0xfc   : > { %v455_v57 = vadd.f32 %v959_v23, %v432_v53  ;;  %v463_v58 = vadd.f32 %v959_v23, %v440_v54  ;;  %v670_v60 = vpop.f32.mrb[6].mxu1  ;;  %472 = vst [vmem:[%s965_s27 + $0x28] sm:$0xff] %v456_v55  ;;  %v435_v61 = vmul.f32 0.17677669, %v658_v59  ;;  %v379_v63 = vpop.f32.mrb[7].mxu0 }
  0xfd   : > { %480 = vst [vmem:[%s965_s27 + $0x68] sm:$0xff] %v464_v56  ;;  %v443_v62 = vmul.f32 0.17677669, %v670_v60  ;;  %v419_v0 = vpop.f32.mrb[7].mxu1  ;;  %v434_v1 = vmul.f32 0.17677669, %v379_v63 }
  0xfe   : > { %471 = vst [vmem:[%s965_s27 + $0x20] sm:$0xff] %v455_v57  ;;  %479 = vst [vmem:[%s965_s27 + $0x60] sm:$0xff] %v463_v58  ;;  %v442_v2 = vmul.f32 0.17677669, %v419_v0  ;;  %v458_v3 = vadd.f32 %v959_v23, %v435_v61 }
  0xff   : > { %v466_v4 = vadd.f32 %v959_v23, %v443_v62  ;;  %v457_v5 = vadd.f32 %v959_v23, %v434_v1 }
 0x100   : > { %v465_v6 = vadd.f32 %v959_v23, %v442_v2  ;;  %474 = vst [vmem:[%s965_s27 + $0x38] sm:$0xff] %v458_v3 }
 0x101   : > { %482 = vst [vmem:[%s965_s27 + $0x78] sm:$0xff] %v466_v4  ;;  %473 = vst [vmem:[%s965_s27 + $0x30] sm:$0xff] %v457_v5 }
 0x102   : > { %481 = vst [vmem:[%s965_s27 + $0x70] sm:$0xff] %v465_v6 }
 0x103   : > { %753 = shalt.err (!%p750_p5)
}
 0x104   : > { %s754_s10 = scalar_lea.hbm %s994_s4, 2048  ;;  %s758_s19 = scalar_lea.hbm %s1055_s3, 4096 }
 0x105   : > { %p755_p6 = scmp.ne.s32.totalorder %s994_s4, %s754_s10  ;;  %p759_p10 = scmp.lt.u32.totalorder %s994_s4, %s1055_s3 }
 0x106   : > { %p760_p11 = scmp.lt.u32.totalorder %s758_s19, %s754_s10  ;;  %p762_p13 = scmp.lt.u32.totalorder %s754_s10, %s994_s4 }
 0x107   : > { %p756_p7 = pnand %p755_p6, %p883_p4 }
 0x108   : > { %p761_p12 = por %p760_p11, %p759_p10 }
 0x109   : > { %p757_p9 = pneg %p756_p7 }
 0x10a   : > { %p763_p0 = por %p762_p13, %p761_p12 }
 0x10c   : > { %p764_p1 = pnand %p763_p0, %p757_p9 }
 0x10e   : > { %767 = shalt.err (!%p764_p1)
}
 0x10f   : > { %s821_s26 = smov 128   ;;  %s822_s27 = smov 8  }
 0x110   : > { %683 = dma.vmem_to_hbm [thread:$0]  (%p883_p4), %s996_s29, 2048, %s994_s4, %s1006_s5, %s821_s26, %s821_s26, %s822_s27  }
 0x111 PF: > { %p689_p2 = scmp.ge.s32.totalorder %s818_s17, 2  ;;  %s514_s28 = sand.u32 1, %s798_s12  }
 0x112   : > { %s515_s15 = scalar_lea.sflag [#allocation3], %s514_s28 }
 0x113   : > { %p686_p3 = pnand %p689_p2, %p890_p8 }
 0x115   : > { %793 = dma.done.wait (!%p686_p3), %s515_s15, 2048  }
 0x116   : > { %795 = vsyncadd (!%p686_p3), %s515_s15, 4294965248  ;;  %s16_s17 = sadd.s32 1, %s818_s17   ;;  %s1058_s12 = smov %s802_s13 }
 0x117   : > { %p13_p5 = scmp.ge.s32.totalorder %s16_s17, 4   ;;  %s1059_s13 = smov %s806_s14 }
 0x118   : > { %s1060_s14 = smov %s896_s25  ;;  %s1061_s15 = smov %s814_s16 }
 0x119   : > { %s1062_s16 = smov %s1064_s20  ;;  %15 = sbr.rel (!%p13_p5) target bundleno = 4 (0x4), region = 70 }
 0x120   :  { %520 = vsyncpa [#allocation3], 1 }
 0x121   :  { %522 = vsyncpa [#allocation3 + $0x1], 1 }

// kernel: tpu_custom_call.1
= control target key start
LH: loop header
LB: loop body
LE: loop exit
PB: predicated region body
PF: predicated region fallthrough
CT: control target
= control target key end

     0   :  { %8 = vsyncpa [#allocation3], 0  ;;  %s1052_s0 = inlined_call_operand.vmem [shape: f32[2,128,32], index: 0, kind: input, shape index: {}]   ;;  %s1053_s1 = inlined_call_operand.vmem [shape: f32[2,1,128], index: 1, kind: input, shape index: {}]   ;;  %s1054_s2 = inlined_call_operand.vmem [shape: f32[32,128], index: 2, kind: input, shape index: {}]   ;;  %s1055_s3 = inlined_call_operand.hbm [shape: f32[2,128,128], index: 3, kind: output, shape index: {}]  }
   0x1   :  { %10 = vsyncpa [#allocation3 + $0x1], 0  ;;  %s843_s12 = smov 0   ;;  %s845_s13 = smov 0  }
   0x2   :  { %s847_s14 = smov 0   ;;  %s849_s15 = smov 0  }
   0x3   :  { %s851_s16 = smov 0   ;;  %s853_s17 = smov 0  }
   0x4 LB: > { %s587_s18 = sadd.s32 4294967295, %s818_s17   ;;  %s588_s19 = sadd.s32 4294967294, %s818_s17   ;;  %s818_s17 = sphi %s853_s17, %s16_s17   ;;  %s814_s16 = sphi %s851_s16, %s1062_s16   ;;  %s810_s15 = sphi %s849_s15, %s1061_s15   ;;  %s806_s14 = sphi %s847_s14, %s1060_s14   ;;  %s802_s13 = sphi %s845_s13, %s1059_s13   ;;  %s798_s12 = sphi %s843_s12, %s1058_s12  }
   0x5   : > { %s28_s20 = sadd.s32 1, %s814_s16  ;;  %s112_s21 = sadd.s32 1, %s806_s14 }
   0x6   : > { %p30_p0 = scmp.ge.s32.totalorder %s28_s20, 2  ;;  %p122_p1 = scmp.ne.s32.totalorder %s806_s14, %s802_s13 }
   0x7   : > { %p123_p2 = scmp.eq.s32.totalorder %s587_s18, 1  ;;  %p128_p3 = scmp.ne.s32.totalorder %s802_s13, %s798_s12 }
   0x8   : > { %s1064_s20 = smov (%p30_p0, %s28_s20), 0  ;;  %p129_p5 = scmp.eq.s32.totalorder %s588_s19, 1 }
   0x9   : > { %p883_p4 = por %p123_p2, %p122_p1  ;;  %s107_s23 = ssub.s32 %s814_s16, %s1064_s20 }
   0xa   : > { %p591_p6 = scmp.ge.s32.totalorder %s818_s17, 1  ;;  %p110_p7 = scmp.eq.s32.totalorder %s107_s23, 0 }
   0xb   : > { %p890_p8 = por %p129_p5, %p128_p3  ;;  %p169_p9 = scmp.lt.s32.totalorder %s818_s17, 3 }
   0xc   : > { %s896_s25 = scalar_select %p110_p7, %s806_s14, %s112_s21  }
   0xd   : > { %p170_p10 = pnand %p591_p6, %p169_p9 }
   0xe   : > { %v230_v0 = vld [vmem:[%s1054_s2] sm:$0xff] (!%p170_p10)  ;;  %v231_v1 = vld [vmem:[%s1054_s2 + $0x8] sm:$0xff] (!%p170_p10)  ;;  %v232_v2 = vld [vmem:[%s1054_s2 + $0x10] sm:$0xff] (!%p170_p10)  ;;  %p201_p11 = scmp.lt.s32.totalorder (!%p170_p10), %s810_s15, 1  ;;  %vm234_vm0 = vcmask (!%p170_p10), 261120   ;;  %s197_s18 = sand.u32 (!%p170_p10), 1, %s802_s13  }
   0xf   : > { %173 = sbr.rel (%p170_p10) target bundleno = 273 (0x111), region = 32  ;;  %v671_v3 = vpack.c.bf16 (!%p170_p10), %v231_v1, %v230_v0  ;;  %v233_v4 = vld [vmem:[%s1054_s2 + $0x18] sm:$0xff] (!%p170_p10)  ;;  %s592_s26 = sshll.u32 (!%p170_p10), %s197_s18, 7 }
  0x10   : > { %v675_v5 = vpack.c.bf16 (!%p170_p10), %v233_v4, %v232_v2  ;;  %s965_s27 = scalar_lea.vmem (!%p170_p10), [#allocation2], %s592_s26  ;;  %s618_s28 = sshll.u32 (!%p170_p10), %s810_s15, 11 }
  0x11   : > { %672 = vmatprep.subr.bf16.mxu0 (!%p170_p10), %v671_v3  ;;  %679 = vmatprep.subr.bf16.mxu1 (!%p170_p10), %v671_v3  ;;  %s499_s29 = sshll.u32 (!%p170_p10), %s965_s27, 4  ;;  %s994_s4 = scalar_lea.hbm (!%p170_p10), %s1055_s3, %s618_s28  ;;  %s996_s29 = int_to_ptr.vmem [resolvable:$true] %s499_s29 }
  0x12   : > { %674 = vmatpush3.bf16.msra.mxu0 (!%p170_p10), %v671_v3  ;;  %681 = vmatpush3.bf16.msra.mxu1 (!%p170_p10), %v671_v3  ;;  %s1006_s5 = scalar_lea.sflag (!%p170_p10), [#allocation3], %s197_s18  ;;  %s740_s6 = scalar_lea.vmem (!%p170_p10), %s996_s29, 2048 }
  0x13   : > { %676 = vmatprep.subr.bf16.mxu0 (!%p170_p10), %v675_v5  ;;  %680 = vmatprep.subr.bf16.mxu1 (!%p170_p10), %v675_v5  ;;  %p741_p12 = scmp.ne.s32.totalorder (!%p170_p10), %s996_s29, %s740_s6 }
  0x15   : > { %p742_p13 = pnand (!%p170_p10), %p741_p12, %p883_p4 }
  0x16   : > { %s912_s7 = scalar_select %p201_p11, %s810_s15, 1  ;;  %678 = vmatpush3.bf16.msra.mxu0 %v675_v5  ;;  %682 = vmatpush3.bf16.msra.mxu1 %v675_v5 }
  0x17   : > { %p743_p0 = pneg %p742_p13 }
  0x18   : > { %s617_s8 = sshll.u32 %s912_s7, 7  ;;  %s212_s23 = scalar_lea.vmem %s1053_s1, %s912_s7 }
  0x19   : > { %s918_s11 = scalar_lea.vmem %s1052_s0, %s617_s8  ;;  %v959_v23 = vld [vmem:[%s212_s23] ss:$0 sm:$0xff]  ;;  %s820_s7 = smov [#allocation2]  }
  0x1a   : > { %v214_v6 = vld [vmem:[%s918_s11] sm:$0xff]  ;;  %v215_v8 = vld [vmem:[%s918_s11 + $0x8] sm:$0xff]  ;;  %v216_v10 = vld [vmem:[%s918_s11 + $0x10] sm:$0xff]  ;;  %s744_s8 = sshll.u32 %s820_s7, 4  ;;  %s745_s8 = int_to_ptr.vmem [resolvable:$false] %s744_s8 }
  0x1b   : > { %v222_v7 = vld [vmem:[%s918_s11 + $0x40] sm:$0xff]  ;;  %647 = vmatprep.mubr.msk.f32.mxu0 %vm234_vm0, %v214_v6  ;;  %v223_v9 = vld [vmem:[%s918_s11 + $0x48] sm:$0xff]  ;;  %v224_v11 = vld [vmem:[%s918_s11 + $0x50] sm:$0xff]  ;;  %s746_s9 = scalar_lea.vmem %s745_s8, 4096  ;;  %p747_p1 = scmp.lt.s32.totalorder %s996_s29, %s745_s8 }
  0x1c   : > { %659 = vmatprep.mubr.msk.f32.mxu1 %vm234_vm0, %v222_v7  ;;  %648 = vmatmul.mubr.msk.f32.vlgmr.msra.gmra.mrb[0].mxu0 %vm234_vm0, %v215_v8  ;;  %v217_v12 = vld [vmem:[%s918_s11 + $0x18] sm:$0xff]  ;;  %v218_v14 = vld [vmem:[%s918_s11 + $0x20] sm:$0xff]  ;;  %v219_v16 = vld [vmem:[%s918_s11 + $0x28] sm:$0xff]  ;;  %p748_p2 = scmp.lt.s32.totalorder %s746_s9, %s740_s6 }
  0x1d   : > { %660 = vmatmul.mubr.msk.f32.vlgmr.msra.gmra.mrb[0].mxu1 %vm234_vm0, %v223_v9  ;;  %650 = vmatprep.mubr.msk.f32.mxu0 %vm234_vm0, %v216_v10  ;;  %v225_v13 = vld [vmem:[%s918_s11 + $0x58] sm:$0xff]  ;;  %v226_v15 = vld [vmem:[%s918_s11 + $0x60] sm:$0xff]  ;;  %v227_v17 = vld [vmem:[%s918_s11 + $0x68] sm:$0xff] }
  0x1e   : > { %662 = vmatprep.mubr.msk.f32.mxu1 %vm234_vm0, %v224_v11  ;;  %v220_v18 = vld [vmem:[%s918_s11 + $0x30] sm:$0xff]  ;;  %v221_v20 = vld [vmem:[%s918_s11 + $0x38] sm:$0xff]  ;;  %p749_p3 = por %p748_p2, %p747_p1 }
  0x1f   : > { %v228_v19 = vld [vmem:[%s918_s11 + $0x70] sm:$0xff]  ;;  %v229_v21 = vld [vmem:[%s918_s11 + $0x78] sm:$0xff] }
  0x20   : > { %651 = vmatmul.mubr.msk.f32.gmra.mrb[2].mxu0 %vm234_vm0, %v217_v12  ;;  %p750_p5 = pnand %p749_p3, %p743_p0 }
  0x21   : > { %663 = vmatmul.mubr.msk.f32.gmra.mrb[2].mxu1 %vm234_vm0, %v225_v13  ;;  %653 = vmatprep.mubr.msk.f32.mxu0 %vm234_vm0, %v218_v14 }
  0x22   : > { %665 = vmatprep.mubr.msk.f32.mxu1 %vm234_vm0, %v226_v15 }
  0x24   : > { %654 = vmatmul.mubr.msk.f32.gmra.mrb[4].mxu0 %vm234_vm0, %v219_v16 }
  0x25   : > { %666 = vmatmul.mubr.msk.f32.gmra.mrb[4].mxu1 %vm234_vm0, %v227_v17  ;;  %656 = vmatprep.mubr.msk.f32.mxu0 %vm234_vm0, %v220_v18 }
  0x26   : > { %668 = vmatprep.mubr.msk.f32.mxu1 %vm234_vm0, %v228_v19 }
  0x28   : > { %657 = vmatmul.mubr.msk.f32.gmra.mrb[6].mxu0 %vm234_vm0, %v221_v20 }
  0x29   : > { %669 = vmatmul.mubr.msk.f32.gmra.mrb[6].mxu1 %vm234_vm0, %v229_v21 }
  0xef   : > { %v649_v22 = vpop.f32.mrb[0].mxu0 }
  0xf0   : > { %v661_v24 = vpop.f32.mrb[0].mxu1  ;;  %v429_v25 = vmul.f32 0.17677669, %v649_v22  ;;  %v349_v27 = vpop.f32.mrb[1].mxu0 }
  0xf1   : > { %v437_v26 = vmul.f32 0.17677669, %v661_v24  ;;  %v389_v28 = vpop.f32.mrb[1].mxu1  ;;  %v428_v29 = vmul.f32 0.17677669, %v349_v27 }
  0xf2   : > { %v436_v30 = vmul.f32 0.17677669, %v389_v28  ;;  %v452_v31 = vadd.f32 %v959_v23, %v429_v25 }
  0xf3   : > { %v460_v32 = vadd.f32 %v959_v23, %v437_v26  ;;  %v451_v33 = vadd.f32 %v959_v23, %v428_v29  ;;  %v652_v35 = vpop.f32.mrb[2].mxu0 }
  0xf4   : > { %v459_v34 = vadd.f32 %v959_v23, %v436_v30  ;;  %v664_v36 = vpop.f32.mrb[2].mxu1  ;;  %468 = vst [vmem:[%s965_s27 + $0x8] sm:$0xff] %v452_v31  ;;  %v431_v37 = vmul.f32 0.17677669, %v652_v35  ;;  %v359_v39 = vpop.f32.mrb[3].mxu0 }
  0xf5   : > { %476 = vst [vmem:[%s965_s27 + $0x48] sm:$0xff] %v460_v32  ;;  %v439_v38 = vmul.f32 0.17677669, %v664_v36  ;;  %v399_v40 = vpop.f32.mrb[3].mxu1  ;;  %467 = vst [vmem:[%s965_s27] sm:$0xff] %v451_v33  ;;  %v430_v41 = vmul.f32 0.17677669, %v359_v39 }
  0xf6   : > { %475 = vst [vmem:[%s965_s27 + $0x40] sm:$0xff] %v459_v34  ;;  %v438_v42 = vmul.f32 0.17677669, %v399_v40  ;;  %v454_v43 = vadd.f32 %v959_v23, %v431_v37 }
  0xf7   : > { %v462_v44 = vadd.f32 %v959_v23, %v439_v38  ;;  %v453_v45 = vadd.f32 %v959_v23, %v430_v41  ;;  %v655_v47 = vpop.f32.mrb[4].mxu0 }
  0xf8   : > { %v461_v46 = vadd.f32 %v959_v23, %v438_v42  ;;  %v667_v48 = vpop.f32.mrb[4].mxu1  ;;  %470 = vst [vmem:[%s965_s27 + $0x18] sm:$0xff] %v454_v43  ;;  %v433_v49 = vmul.f32 0.17677669, %v655_v47  ;;  %v369_v51 = vpop.f32.mrb[5].mxu0 }
  0xf9   : > { %478 = vst [vmem:[%s965_s27 + $0x58] sm:$0xff] %v462_v44  ;;  %v441_v50 = vmul.f32 0.17677669, %v667_v48  ;;  %v409_v52 = vpop.f32.mrb[5].mxu1  ;;  %469 = vst [vmem:[%s965_s27 + $0x10] sm:$0xff] %v453_v45 }
  0xfa   : > { %477 = vst [vmem:[%s965_s27 + $0x50] sm:$0xff] %v461_v46  ;;  %v432_v53 = vmul.f32 0.17677669, %v369_v51  ;;  %v440_v54 = vmul.f32 0.17677669, %v409_v52  ;;  %v456_v55 = vadd.f32 %v959_v23, %v433_v49 }
  0xfb   : > { %v464_v56 = vadd.f32 %v959_v23, %v441_v50  ;;  %v658_v59 = vpop.f32.mrb[6].mxu0 }
  0xfc   : > { %v455_v57 = vadd.f32 %v959_v23, %v432_v53  ;;  %v463_v58 = vadd.f32 %v959_v23, %v440_v54  ;;  %v670_v60 = vpop.f32.mrb[6].mxu1  ;;  %472 = vst [vmem:[%s965_s27 + $0x28] sm:$0xff] %v456_v55  ;;  %v435_v61 = vmul.f32 0.17677669, %v658_v59  ;;  %v379_v63 = vpop.f32.mrb[7].mxu0 }
  0xfd   : > { %480 = vst [vmem:[%s965_s27 + $0x68] sm:$0xff] %v464_v56  ;;  %v443_v62 = vmul.f32 0.17677669, %v670_v60  ;;  %v419_v0 = vpop.f32.mrb[7].mxu1  ;;  %v434_v1 = vmul.f32 0.17677669, %v379_v63 }
  0xfe   : > { %471 = vst [vmem:[%s965_s27 + $0x20] sm:$0xff] %v455_v57  ;;  %479 = vst [vmem:[%s965_s27 + $0x60] sm:$0xff] %v463_v58  ;;  %v442_v2 = vmul.f32 0.17677669, %v419_v0  ;;  %v458_v3 = vadd.f32 %v959_v23, %v435_v61 }
  0xff   : > { %v466_v4 = vadd.f32 %v959_v23, %v443_v62  ;;  %v457_v5 = vadd.f32 %v959_v23, %v434_v1 }
 0x100   : > { %v465_v6 = vadd.f32 %v959_v23, %v442_v2  ;;  %474 = vst [vmem:[%s965_s27 + $0x38] sm:$0xff] %v458_v3 }
 0x101   : > { %482 = vst [vmem:[%s965_s27 + $0x78] sm:$0xff] %v466_v4  ;;  %473 = vst [vmem:[%s965_s27 + $0x30] sm:$0xff] %v457_v5 }
 0x102   : > { %481 = vst [vmem:[%s965_s27 + $0x70] sm:$0xff] %v465_v6 }
 0x103   : > { %753 = shalt.err (!%p750_p5)
}
 0x104   : > { %s754_s10 = scalar_lea.hbm %s994_s4, 2048  ;;  %s758_s19 = scalar_lea.hbm %s1055_s3, 4096 }
 0x105   : > { %p755_p6 = scmp.ne.s32.totalorder %s994_s4, %s754_s10  ;;  %p759_p10 = scmp.lt.u32.totalorder %s994_s4, %s1055_s3 }
 0x106   : > { %p760_p11 = scmp.lt.u32.totalorder %s758_s19, %s754_s10  ;;  %p762_p13 = scmp.lt.u32.totalorder %s754_s10, %s994_s4 }
 0x107   : > { %p756_p7 = pnand %p755_p6, %p883_p4 }
 0x108   : > { %p761_p12 = por %p760_p11, %p759_p10 }
 0x109   : > { %p757_p9 = pneg %p756_p7 }
 0x10a   : > { %p763_p0 = por %p762_p13, %p761_p12 }
 0x10c   : > { %p764_p1 = pnand %p763_p0, %p757_p9 }
 0x10e   : > { %767 = shalt.err (!%p764_p1)
}
 0x10f   : > { %s821_s26 = smov 128   ;;  %s822_s27 = smov 8  }
 0x110   : > { %683 = dma.vmem_to_hbm [thread:$0]  (%p883_p4), %s996_s29, 2048, %s994_s4, %s1006_s5, %s821_s26, %s821_s26, %s822_s27  }
 0x111 PF: > { %p689_p2 = scmp.ge.s32.totalorder %s818_s17, 2  ;;  %s514_s28 = sand.u32 1, %s798_s12  }
 0x112   : > { %s515_s15 = scalar_lea.sflag [#allocation3], %s514_s28 }
 0x113   : > { %p686_p3 = pnand %p689_p2, %p890_p8 }
 0x115   : > { %793 = dma.done.wait (!%p686_p3), %s515_s15, 2048  }
 0x116   : > { %795 = vsyncadd (!%p686_p3), %s515_s15, 4294965248  ;;  %s16_s17 = sadd.s32 1, %s818_s17   ;;  %s1058_s12 = smov %s802_s13 }
 0x117   : > { %p13_p5 = scmp.ge.s32.totalorder %s16_s17, 4   ;;  %s1059_s13 = smov %s806_s14 }
 0x118   : > { %s1060_s14 = smov %s896_s25  ;;  %s1061_s15 = smov %s814_s16 }
 0x119   : > { %s1062_s16 = smov %s1064_s20  ;;  %15 = sbr.rel (!%p13_p5) target bundleno = 4 (0x4), region = 70 }
 0x120   :  { %520 = vsyncpa [#allocation3], 1 }
 0x121   :  { %522 = vsyncpa [#allocation3 + $0x1], 1 }

</bundles_post_ra>
